<compile_context>
chip_gen: v5e
topology: v5e:2x2
jax: 0.10.0
libtpu: 0.0.40
codegen_flags: <defaults>
</compile_context>

<pallas_src>
import functools

import jax
import jax.numpy as jnp
from jax.experimental import pallas as pl
from jax.experimental.pallas import tpu as pltpu


def _round_up(x, m):
    return ((x + m - 1) // m) * m


def _vmem_limit_bytes():
    """Derive the scoped-VMEM cap from the chip (64 MiB/TC on v7x, 128 MiB on
    v5e/v6e) instead of hard-coding; leave 1/4 headroom for Mosaic temps."""
    try:
        cap = pltpu.get_tpu_info().vmem_capacity_bytes
    except Exception:  # pragma: no cover - conservative fallback
        cap = 64 * 1024 * 1024
    return max(32 * 1024 * 1024, (cap // 4) * 3)


def _moe_kernel(x_ref, wg_ref, bg_ref, we_ref, be_ref, o_ref, gate_ref,
                *, num_experts):
    # x_ref    : (TM, H)       token tile (native dtype, resident across j)
    # wg_ref   : (H, E)        gate weight (grid-invariant, unpadded)
    # bg_ref   : (1, E)        gate bias   (grid-invariant)
    # we_ref   : (E, H, TN)    expert-weight lane tile (streamed along O)
    # be_ref   : (E, TN)       expert-bias lane tile
    # o_ref    : (TM, TN)      lane-dense output tile
    # gate_ref : (TM, E) f32   scratch: softmax gate, computed once per token
    #                          tile (lane axis j is the minor grid axis)
    j = pl.program_id(1)
    x = x_ref[...]

    # ---- gate: compute once per token tile, cache across lane tiles --------
    @pl.when(j == 0)
    def _():
        logits = jnp.dot(x, wg_ref[...], preferred_element_type=jnp.float32)
        logits = logits + bg_ref[...].astype(jnp.float32)
        logits = logits - jnp.max(logits, axis=-1, keepdims=True)
        p = jnp.exp(logits)
        inv = pl.reciprocal(jnp.sum(p, axis=-1, keepdims=True), approx=True)
        gate_ref[...] = p * inv

    gate = gate_ref[...]                                       # (TM, E) f32

    # ---- softmax-weighted expert bias as a small MXU matmul: gate @ B ------
    acc = jnp.dot(gate, be_ref[...].astype(jnp.float32),
                  preferred_element_type=jnp.float32)          # (TM, TN)

    # ---- gated sum of streamed expert matmuls (static unroll over small E) -
    for e in range(num_experts):
        y_e = jnp.dot(x, we_ref[e], preferred_element_type=jnp.float32)
        acc = acc + gate[:, e:e + 1] * y_e

    o_ref[...] = acc.astype(o_ref.dtype)


def prepare_moe_params(gate_w, gate_b, expert_w, expert_b):
    """One-time parameter layout prep — call once, reuse across forwards.
    gate_w: (H, E), gate_b: (E,), expert_w: (E, H, O), expert_b: (E, O)."""
    E, H, O = expert_w.shape
    o_pad = _round_up(O, 128)
    if o_pad != O:
        expert_w = jnp.pad(expert_w, ((0, 0), (0, 0), (0, o_pad - O)))
        expert_b = jnp.pad(expert_b, ((0, 0), (0, o_pad - O)))
    return {
        "gate_w": gate_w,                      # (H, E)   unpadded
        "gate_b": gate_b.reshape(1, E),        # (1, E)
        "expert_w": expert_w,                  # (E, H, o_pad)
        "expert_b": expert_b,                  # (E, o_pad)
        "out_features": O,
    }


def moe_forward(x, params, *, token_tile=512, lane_tile=512):
    """x: (B, S, H); params from prepare_moe_params. Returns (B, S, O)."""
    gate_w = params["gate_w"]
    gate_b = params["gate_b"]
    expert_w = params["expert_w"]
    expert_b = params["expert_b"]
    O = params["out_features"]

    B, S, H = x.shape
    E, H2, o_pad = expert_w.shape
    assert H2 == H
    N = B * S

    # --- token tiling: big tile (sweep 256/512), sublane-packed, padded tail
    sub = 8 if jnp.dtype(x.dtype).itemsize >= 4 else 16
    tm = min(_round_up(token_tile, sub), _round_up(N, sub))
    n_pad = _round_up(N, tm)
    x2 = x.reshape(N, H)
    if n_pad != N:
        x2 = jnp.pad(x2, ((0, n_pad - N), (0, 0)))

    # --- lane tiling over (padded) output features: multiple of 128 that
    #     divides o_pad, at most `lane_tile`
    tn = min(_round_up(lane_tile, 128), o_pad)
    while o_pad % tn:
        tn -= 128

    grid = (n_pad // tm, o_pad // tn)

    kernel = functools.partial(_moe_kernel, num_experts=E)

    itemsize = jnp.dtype(x.dtype).itemsize
    flops = int(2 * n_pad * H * E * o_pad      # expert matmuls
                + 2 * n_pad * H * E            # gate matmul
                + 2 * n_pad * E * o_pad)       # gate @ bias
    bytes_accessed = int(
        x2.size * x2.dtype.itemsize
        + expert_w.size * expert_w.dtype.itemsize
        + gate_w.size * gate_w.dtype.itemsize
        + expert_b.size * expert_b.dtype.itemsize
        + gate_b.size * gate_b.dtype.itemsize
        + n_pad * o_pad * itemsize)

    out = pl.pallas_call(
        kernel,
        out_shape=jax.ShapeDtypeStruct((n_pad, o_pad), x.dtype),
        grid=grid,
        in_specs=[
            pl.BlockSpec((tm, H), lambda i, j: (i, 0)),        # x (resident over j)
            pl.BlockSpec((H, E), lambda i, j: (0, 0)),         # gate W (invariant)
            pl.BlockSpec((1, E), lambda i, j: (0, 0)),         # gate b (invariant)
            pl.BlockSpec((E, H, tn), lambda i, j: (0, 0, j)),  # expert W lane tile
            pl.BlockSpec((E, tn), lambda i, j: (0, j)),        # expert b lane tile
        ],
        out_specs=pl.BlockSpec((tm, tn), lambda i, j: (i, j)),
        scratch_shapes=[pltpu.VMEM((tm, E), jnp.float32)],     # cached gate
        compiler_params=pltpu.CompilerParams(
            dimension_semantics=("parallel", "arbitrary"),
            vmem_limit_bytes=_vmem_limit_bytes(),
        ),
        cost_estimate=pl.CostEstimate(
            flops=flops,
            transcendentals=int(n_pad * E),
            bytes_accessed=bytes_accessed,
        ),
    )(x2, gate_w, gate_b, expert_w, expert_b)

    return out[:N, :O].reshape(B, S, O)


def moe_forward_unprepared(x, gate_w, gate_b, expert_w, expert_b, **kw):
    """Convenience: prepare + apply (prefer caching prepare_moe_params)."""
    return moe_forward(x, prepare_moe_params(gate_w, gate_b, expert_w,
                                             expert_b), **kw)


def _reference(x, gate_w, gate_b, expert_w, expert_b):
    B, S, H = x.shape
    xf = x.reshape(B * S, H).astype(jnp.float32)
    gate = jax.nn.softmax(
        xf @ gate_w.astype(jnp.float32) + gate_b.astype(jnp.float32), axis=-1)
    eo = (jnp.einsum("nh,eho->neo", xf, expert_w.astype(jnp.float32))
          + expert_b.astype(jnp.float32)[None])                 # (N, E, O)
    out = jnp.sum(eo * gate[:, :, None], axis=1)
    return out.reshape(B, S, -1)


if __name__ == "__main__":
    # Small shapes consistent with the module's forward.
    batch, seq, hidden = 2, 8, 32
    num_experts, output_size = 4, 64

    key = jax.random.PRNGKey(0)
    kx, kgw, kgb, kew, keb = jax.random.split(key, 5)

    x = jax.random.normal(kx, (batch, seq, hidden), dtype=jnp.float32)

    # Deterministic parameter init (nn.Linear weights stored as (in, out)).
    gate_w = jax.random.normal(kgw, (hidden, num_experts), jnp.float32) * 0.1
    gate_b = jax.random.normal(kgb, (num_experts,), jnp.float32) * 0.1
    expert_w = jax.random.normal(
        kew, (num_experts, hidden, output_size), jnp.float32) * 0.1
    expert_b = jax.random.normal(
        keb, (num_experts, output_size), jnp.float32) * 0.1

    # Parameter layout prep is done once and reused across forward calls.
    params = prepare_moe_params(gate_w, gate_b, expert_w, expert_b)

    out = moe_forward(x, params)
    out = jax.block_until_ready(out)

    ref = _reference(x, gate_w, gate_b, expert_w, expert_b)
    assert out.shape == (batch, seq, output_size)
    # Tolerance accounts for the approximate EUP reciprocal in the softmax.
    assert jnp.allclose(out, ref, atol=2e-3, rtol=2e-3), "mismatch vs reference"

    print("KERNEL_OK")
</pallas_src>

<mosaic_0001>
module attributes {stable_mosaic.version = 11 : i64} {
  func.func @_moe_kernel(%arg0: i32, %arg1: i32, %arg2: memref<16x32xf32, #tpu.memory_space<vmem>>, %arg3: memref<32x4xf32, #tpu.memory_space<vmem>>, %arg4: memref<1x4xf32, #tpu.memory_space<vmem>>, %arg5: memref<4x32x128xf32, #tpu.memory_space<vmem>>, %arg6: memref<4x128xf32, #tpu.memory_space<vmem>>, %arg7: memref<16x128xf32, #tpu.memory_space<vmem>>, %arg8: memref<16x4xf32, #tpu.memory_space<vmem>>) attributes {dimension_semantics = [#tpu.dimension_semantics<parallel>, #tpu.dimension_semantics<arbitrary>], iteration_bounds = array<i64: 1, 1>, scalar_prefetch = 0 : i64, scratch_operands = 1 : i64, tpu.core_type = #tpu.core_type<tc>, window_params = [{transform_indices = @transform_0, window_bounds = array<i64: 16, 32>}, {pipeline_mode = #tpu.pipeline_mode<synchronous>, transform_indices = @transform_1, window_bounds = array<i64: 32, 4>}, {pipeline_mode = #tpu.pipeline_mode<synchronous>, transform_indices = @transform_2, window_bounds = array<i64: 1, 4>}, {transform_indices = @transform_3, window_bounds = array<i64: 4, 32, 128>}, {transform_indices = @transform_4, window_bounds = array<i64: 4, 128>}, {transform_indices = @transform_5, window_bounds = array<i64: 16, 128>}]} {
    %c0 = arith.constant 0 : index
    %c0_0 = arith.constant 0 : index
    %0 = vector.load %arg2[%c0, %c0_0] : memref<16x32xf32, #tpu.memory_space<vmem>>, vector<16x32xf32>
    %c0_i32 = arith.constant 0 : i32
    %1 = arith.cmpi eq, %arg1, %c0_i32 : i32
    %2 = arith.extui %1 : i1 to i32
    %c0_i32_1 = arith.constant 0 : i32
    %3 = arith.cmpi ne, %2, %c0_i32_1 : i32
    scf.if %3 {
      %c0_21 = arith.constant 0 : index
      %c0_22 = arith.constant 0 : index
      %36 = vector.load %arg3[%c0_21, %c0_22] : memref<32x4xf32, #tpu.memory_space<vmem>>, vector<32x4xf32>
      %cst_23 = arith.constant dense<0.000000e+00> : vector<16x4xf32>
      %37 = tpu.matmul %0, %36, %cst_23 {dimension_numbers = #tpu.dot_dimension_numbers<[1], [0], [0], [1], [0, 0, 1, 1], [], []>} : vector<16x32xf32>, vector<32x4xf32>, vector<16x4xf32> -> vector<16x4xf32>
      %c0_24 = arith.constant 0 : index
      %c0_25 = arith.constant 0 : index
      %38 = vector.load %arg4[%c0_24, %c0_25] : memref<1x4xf32, #tpu.memory_space<vmem>>, vector<1x4xf32>
      %39 = vector.broadcast %38 : vector<1x4xf32> to vector<16x4xf32>
      %40 = arith.addf %37, %39 : vector<16x4xf32>
      %cst_26 = arith.constant dense<0xFF800000> : vector<16xf32>
      %41 = vector.multi_reduction <maximumf>, %40, %cst_26 [1] : vector<16x4xf32> to vector<16xf32>
      %42 = vector.shape_cast %41 : vector<16xf32> to vector<16x1xf32>
      %43 = vector.broadcast %42 : vector<16x1xf32> to vector<16x4xf32>
      %44 = arith.subf %40, %43 : vector<16x4xf32>
      %45 = math.exp %44 : vector<16x4xf32>
      %cst_27 = arith.constant dense<0.000000e+00> : vector<16xf32>
      %46 = vector.multi_reduction <add>, %45, %cst_27 [1] : vector<16x4xf32> to vector<16xf32>
      %47 = vector.shape_cast %46 : vector<16xf32> to vector<16x1xf32>
      %48 = tpu.reciprocal %47 {approx = true} : vector<16x1xf32> -> vector<16x1xf32>
      %49 = vector.broadcast %48 : vector<16x1xf32> to vector<16x4xf32>
      %50 = arith.mulf %45, %49 : vector<16x4xf32>
      %c0_28 = arith.constant 0 : index
      %c0_29 = arith.constant 0 : index
      %51 = vector.load %arg8[%c0_28, %c0_29] : memref<16x4xf32, #tpu.memory_space<vmem>>, vector<16x4xf32>
      tpu.vector_store %arg8[%c0_28, %c0_29], %50 {strides = array<i32>} : memref<16x4xf32, #tpu.memory_space<vmem>>, vector<16x4xf32>,
    } else {
    }
    %c0_2 = arith.constant 0 : index
    %c0_3 = arith.constant 0 : index
    %4 = vector.load %arg8[%c0_2, %c0_3] : memref<16x4xf32, #tpu.memory_space<vmem>>, vector<16x4xf32>
    %c0_4 = arith.constant 0 : index
    %c0_5 = arith.constant 0 : index
    %5 = vector.load %arg6[%c0_4, %c0_5] : memref<4x128xf32, #tpu.memory_space<vmem>>, vector<4x128xf32>
    %cst = arith.constant dense<0.000000e+00> : vector<16x128xf32>
    %6 = tpu.matmul %4, %5, %cst {dimension_numbers = #tpu.dot_dimension_numbers<[1], [0], [0], [1], [0, 0, 1, 1], [], []>} : vector<16x4xf32>, vector<4x128xf32>, vector<16x128xf32> -> vector<16x128xf32>
    %c0_6 = arith.constant 0 : index
    %c0_7 = arith.constant 0 : index
    %c0_8 = arith.constant 0 : index
    %7 = vector.load %arg5[%c0_6, %c0_7, %c0_8] : memref<4x32x128xf32, #tpu.memory_space<vmem>>, vector<1x32x128xf32>
    %8 = vector.shape_cast %7 : vector<1x32x128xf32> to vector<32x128xf32>
    %cst_9 = arith.constant dense<0.000000e+00> : vector<16x128xf32>
    %9 = tpu.matmul %0, %8, %cst_9 {dimension_numbers = #tpu.dot_dimension_numbers<[1], [0], [0], [1], [0, 0, 1, 1], [], []>} : vector<16x32xf32>, vector<32x128xf32>, vector<16x128xf32> -> vector<16x128xf32>
    %10 = vector.extract_strided_slice %4 {offsets = [0, 0], sizes = [16, 1], strides = [1, 1]} : vector<16x4xf32> to vector<16x1xf32>
    %11 = vector.broadcast %10 : vector<16x1xf32> to vector<16x128xf32>
    %12 = arith.mulf %11, %9 : vector<16x128xf32>
    %13 = arith.addf %6, %12 : vector<16x128xf32>
    %c1 = arith.constant 1 : index
    %c0_10 = arith.constant 0 : index
    %c0_11 = arith.constant 0 : index
    %14 = vector.load %arg5[%c1, %c0_10, %c0_11] : memref<4x32x128xf32, #tpu.memory_space<vmem>>, vector<1x32x128xf32>
    %15 = vector.shape_cast %14 : vector<1x32x128xf32> to vector<32x128xf32>
    %cst_12 = arith.constant dense<0.000000e+00> : vector<16x128xf32>
    %16 = tpu.matmul %0, %15, %cst_12 {dimension_numbers = #tpu.dot_dimension_numbers<[1], [0], [0], [1], [0, 0, 1, 1], [], []>} : vector<16x32xf32>, vector<32x128xf32>, vector<16x128xf32> -> vector<16x128xf32>
    %17 = vector.extract_strided_slice %4 {offsets = [0, 1], sizes = [16, 1], strides = [1, 1]} : vector<16x4xf32> to vector<16x1xf32>
    %18 = vector.broadcast %17 : vector<16x1xf32> to vector<16x128xf32>
    %19 = arith.mulf %18, %16 : vector<16x128xf32>
    %20 = arith.addf %13, %19 : vector<16x128xf32>
    %c2 = arith.constant 2 : index
    %c0_13 = arith.constant 0 : index
    %c0_14 = arith.constant 0 : index
    %21 = vector.load %arg5[%c2, %c0_13, %c0_14] : memref<4x32x128xf32, #tpu.memory_space<vmem>>, vector<1x32x128xf32>
    %22 = vector.shape_cast %21 : vector<1x32x128xf32> to vector<32x128xf32>
    %cst_15 = arith.constant dense<0.000000e+00> : vector<16x128xf32>
    %23 = tpu.matmul %0, %22, %cst_15 {dimension_numbers = #tpu.dot_dimension_numbers<[1], [0], [0], [1], [0, 0, 1, 1], [], []>} : vector<16x32xf32>, vector<32x128xf32>, vector<16x128xf32> -> vector<16x128xf32>
    %24 = vector.extract_strided_slice %4 {offsets = [0, 2], sizes = [16, 1], strides = [1, 1]} : vector<16x4xf32> to vector<16x1xf32>
    %25 = vector.broadcast %24 : vector<16x1xf32> to vector<16x128xf32>
    %26 = arith.mulf %25, %23 : vector<16x128xf32>
    %27 = arith.addf %20, %26 : vector<16x128xf32>
    %c3 = arith.constant 3 : index
    %c0_16 = arith.constant 0 : index
    %c0_17 = arith.constant 0 : index
    %28 = vector.load %arg5[%c3, %c0_16, %c0_17] : memref<4x32x128xf32, #tpu.memory_space<vmem>>, vector<1x32x128xf32>
    %29 = vector.shape_cast %28 : vector<1x32x128xf32> to vector<32x128xf32>
    %cst_18 = arith.constant dense<0.000000e+00> : vector<16x128xf32>
    %30 = tpu.matmul %0, %29, %cst_18 {dimension_numbers = #tpu.dot_dimension_numbers<[1], [0], [0], [1], [0, 0, 1, 1], [], []>} : vector<16x32xf32>, vector<32x128xf32>, vector<16x128xf32> -> vector<16x128xf32>
    %31 = vector.extract_strided_slice %4 {offsets = [0, 3], sizes = [16, 1], strides = [1, 1]} : vector<16x4xf32> to vector<16x1xf32>
    %32 = vector.broadcast %31 : vector<16x1xf32> to vector<16x128xf32>
    %33 = arith.mulf %32, %30 : vector<16x128xf32>
    %34 = arith.addf %27, %33 : vector<16x128xf32>
    %c0_19 = arith.constant 0 : index
    %c0_20 = arith.constant 0 : index
    %35 = vector.load %arg7[%c0_19, %c0_20] : memref<16x128xf32, #tpu.memory_space<vmem>>, vector<16x128xf32>
    tpu.vector_store %arg7[%c0_19, %c0_20], %34 {strides = array<i32>} : memref<16x128xf32, #tpu.memory_space<vmem>>, vector<16x128xf32>,
    return
  }
  func.func @transform_0(%arg0: i32, %arg1: i32) -> (i32, i32) {
    %c0_i32 = arith.constant 0 : i32
    %c0_i32_0 = arith.constant 0 : i32
    return %arg0, %c0_i32 : i32, i32
  }
  func.func @transform_1(%arg0: i32, %arg1: i32) -> (i32, i32) {
    %c0_i32 = arith.constant 0 : i32
    %c0_i32_0 = arith.constant 0 : i32
    %c0_i32_1 = arith.constant 0 : i32
    return %c0_i32, %c0_i32_0 : i32, i32
  }
  func.func @transform_2(%arg0: i32, %arg1: i32) -> (i32, i32) {
    %c0_i32 = arith.constant 0 : i32
    %c0_i32_0 = arith.constant 0 : i32
    %c0_i32_1 = arith.constant 0 : i32
    return %c0_i32, %c0_i32_0 : i32, i32
  }
  func.func @transform_3(%arg0: i32, %arg1: i32) -> (i32, i32, i32) {
    %c0_i32 = arith.constant 0 : i32
    %c0_i32_0 = arith.constant 0 : i32
    %c0_i32_1 = arith.constant 0 : i32
    return %c0_i32, %c0_i32_0, %arg1 : i32, i32, i32
  }
  func.func @transform_4(%arg0: i32, %arg1: i32) -> (i32, i32) {
    %c0_i32 = arith.constant 0 : i32
    %c0_i32_0 = arith.constant 0 : i32
    return %c0_i32, %arg1 : i32, i32
  }
  func.func @transform_5(%arg0: i32, %arg1: i32) -> (i32, i32) {
    %c0_i32 = arith.constant 0 : i32
    return %arg0, %arg1 : i32, i32
  }
}

</mosaic_0001>

<bundles_post_ra>
// kernel: tpu_custom_call.1
= control target key start
LH: loop header
LB: loop body
LE: loop exit
PB: predicated region body
PF: predicated region fallthrough
CT: control target
= control target key end

     0   :  { %10 = vsyncpa [#allocation4], 0  ;;  %s529_s0 = inlined_call_operand.vmem [shape: f32[16,32], index: 0, kind: input, shape index: {}]   ;;  %s530_s1 = inlined_call_operand.vmem [shape: f32[32,4], index: 1, kind: input, shape index: {}]   ;;  %s531_s2 = inlined_call_operand.vmem [shape: f32[1,4], index: 2, kind: input, shape index: {}]   ;;  %s532_s3 = inlined_call_operand.hbm [shape: f32[4,32,128], index: 3, kind: input, shape index: {}]   ;;  %s533_s4 = inlined_call_operand.vmem [shape: f32[4,128], index: 4, kind: input, shape index: {}]   ;;  %s534_s5 = inlined_call_operand.hbm [shape: f32[16,128], index: 5, kind: output, shape index: {}]  }
   0x1   :  { %11 = vsyncpa [#allocation5], 0  ;;  %s22_s20 = sshll.u32 %s532_s3, 4  ;;  %s421_s21 = smov [#allocation3]   ;;  %s23_s20 = int_to_ptr.hbm [resolvable:$true] %s22_s20 }
   0x2   :  { %s24_s22 = sshll.u32 %s421_s21, 4  ;;  %s422_s23 = smov 128   ;;  %s25_s22 = int_to_ptr.vmem [resolvable:$true] %s24_s22 }
   0x3   :  { %s423_s24 = smov 8  }
   0x4   :  { %30 = dma.hbm_to_vmem [thread:$0]  %s23_s20, 2048, %s25_s22, [#allocation4], %s422_s23, %s422_s23, %s423_s24  }
   0x5   :  { %417 = dma.done.wait [#allocation4], 2048  }
   0x6   :  { %418 = vsyncadd [#allocation4], 4294965248  ;;  %v46_v0 = vld [vmem:[%s530_s1 + $0x18] sm:$0xff]  ;;  %v45_v1 = vld [vmem:[%s530_s1 + $0x10] sm:$0xff]  ;;  %vm51_vm0 = vcmask 261120   ;;  %vm81_vm1 = vcmask 31744  }
   0x7   :  { %341 = vmatpush.msra.mxu1 %v46_v0  ;;  %70 = vmatpush.msra.mxu0 %v46_v0  ;;  %v44_v2 = vld [vmem:[%s530_s1 + $0x8] sm:$0xff]  ;;  %v43_v3 = vld [vmem:[%s530_s1] sm:$0xff]  ;;  %v110_v15 = vld [vmem:[#allocation3 + $0x8] sm:$0xff]  ;;  %vm160_vm2 = vcmask 1043456   ;;  %v424_v28 = vmov 1   ;;  %v425_v34 = vmov 0  }
   0x8   :  { %v480_v4 = vld [vmem:[%s529_s0 + $0x8] sm:$0xff]  ;;  %v485_v5 = vld [vmem:[%s529_s0] sm:$0xff]  ;;  %v109_v16 = vld [vmem:[#allocation3] sm:$0xff]  ;;  %356 = vset.pattern.permute.xlu1 %v424_v28  ;;  %355 = vset.pattern.permute.xlu0 %v424_v28  ;;  %v426_v50 = vmov 3   ;;  %v427_v51 = vmov 2   ;;  %s315_s15 = sshll.u32 %s534_s5, 4  ;;  %s316_s15 = int_to_ptr.hbm [resolvable:$true] %s315_s15 }
   0x9   :  { %342 = vmatpush.msra.mxu1 %v45_v1  ;;  %71 = vmatpush.msra.mxu0 %v45_v1  ;;  %v360_v6 = vld [vmem:[%s531_s2] ss:$0 sm:$0xff]  ;;  %v112_v13 = vld [vmem:[#allocation3 + $0x18] sm:$0xff]  ;;  %v269_v33 = vld [vmem:[#allocation3 + $0x68] sm:$0xff] }
   0xa   :  { %v111_v14 = vld [vmem:[#allocation3 + $0x10] sm:$0xff]  ;;  %v271_v29 = vld [vmem:[#allocation3 + $0x78] sm:$0xff]  ;;  %354 = vset.pattern.permute.xlu2 %v425_v34  ;;  %v189_v35 = vld [vmem:[#allocation3 + $0x28] sm:$0xff] }
   0xb   :  { %343 = vmatpush.msra.mxu1 %v44_v2  ;;  %72 = vmatpush.msra.mxu0 %v44_v2  ;;  %v108_v27 = vld [vmem:[%s533_s4] sm:$0xf]  ;;  %v191_v30 = vld [vmem:[#allocation3 + $0x38] sm:$0xff]  ;;  %v268_v36 = vld [vmem:[#allocation3 + $0x60] sm:$0xff]  ;;  %s428_s4 = smov [#allocation6]  }
   0xc   :  { %345 = vmatpush.msk.msra.mxu3 %vm160_vm2, %v108_v27  ;;  %v270_v31 = vld [vmem:[#allocation3 + $0x70] sm:$0xff]  ;;  %332 = vmatpush.msk.msra.mxu2 %vm160_vm2, %v108_v27  ;;  %v188_v37 = vld [vmem:[#allocation3 + $0x20] sm:$0xff]  ;;  %v231_v38 = vld [vmem:[#allocation3 + $0x58] sm:$0xff]  ;;  %s313_s12 = sshll.u32 %s428_s4, 4  ;;  %s314_s12 = int_to_ptr.vmem [resolvable:$true] %s313_s12 }
   0xd   :  { %344 = vmatpush.msra.mxu1 %v43_v3  ;;  %73 = vmatpush.msra.mxu0 %v43_v3  ;;  %v190_v32 = vld [vmem:[#allocation3 + $0x30] sm:$0xff]  ;;  %v229_v40 = vld [vmem:[#allocation3 + $0x48] sm:$0xff]  ;;  %v228_v41 = vld [vmem:[#allocation3 + $0x40] sm:$0xff] }
   0xe   :  { %329 = vmatmul.msk.f32.vlgmr.msra.gmra.mxu1 %vm51_vm0, %v480_v4  ;;  %328 = vmatmul.msk.f32.vlgmr.msra.gmra.mxu0 %vm51_vm0, %v485_v5  ;;  %v230_v39 = vld [vmem:[#allocation3 + $0x50] sm:$0xff] }
   0xf   :  { %132 = vmatpush.msrb.mxu1 %v112_v13  ;;  %284 = vmatpush.msrb.mxu0 %v271_v29 }
  0x10   :  { %204 = vmatpush.msrb.mxu3 %v191_v30  ;;  %244 = vmatpush.msrb.mxu2 %v231_v38 }
  0x11   :  { %133 = vmatpush.msrb.mxu1 %v111_v14  ;;  %285 = vmatpush.msrb.mxu0 %v270_v31 }
  0x12   :  { %205 = vmatpush.msrb.mxu3 %v190_v32  ;;  %245 = vmatpush.msrb.mxu2 %v230_v39 }
  0x13   :  { %134 = vmatpush.msrb.mxu1 %v110_v15  ;;  %286 = vmatpush.msrb.mxu0 %v269_v33 }
  0x14   :  { %206 = vmatpush.msrb.mxu3 %v189_v35  ;;  %246 = vmatpush.msrb.mxu2 %v229_v40 }
  0x15   :  { %135 = vmatpush.msrb.mxu1 %v109_v16  ;;  %287 = vmatpush.msrb.mxu0 %v268_v36 }
  0x16   :  { %330 = vmatmul.msk.f32.vlgmr.msrb.gmra.mxu1 %vm51_vm0, %v485_v5  ;;  %207 = vmatpush.msrb.mxu3 %v188_v37 }
  0x17   :  { %339 = vmatmul.msk.f32.vlgmr.msrb.gmra.mxu0 %vm51_vm0, %v485_v5  ;;  %247 = vmatpush.msrb.mxu2 %v228_v41 }
  0x1e   :  { %331 = vmatmul.msk.f32.gmra.mxu1 %vm51_vm0, %v480_v4 }
  0x1f   :  { %340 = vmatmul.msk.f32.gmra.mxu0 %vm51_vm0, %v480_v4 }
  0x8b   :  { %v78_v7 = vpop.f32.mrf.mxu1  ;;  %v75_v9 = vpop.f32.mrf.mxu0 }
  0x8c   :  { %v79_v8 = vadd.f32 %v360_v6, %v78_v7  ;;  %v76_v11 = vadd.f32 %v360_v6, %v75_v9 }
  0x8e   :  { %v85_v10 = vsel %vm81_vm1, %v79_v8, -inf  ;;  %v82_v12 = vsel %vm81_vm1, %v76_v11, -inf }
  0x8f   :  { %86 = vmax.xlane.f32.xlu0 %v85_v10 }
  0x93   :  { %v137_v57 = vpop.f32.mrf.mxu1 }
  0x94   :  { %v289_v62 = vpop.f32.mrf.mxu0 }
  0x97   :  { %83 = vmax.xlane.f32.xlu0 %v82_v12 }
  0x9c   :  { %v292_v14 = vpop.f32.mrf.mxu0 }
 0x102   :  { %v87_v17 = vpop.xlane.xlu0 %86 }
 0x103   :  { %v89_v18 = vsub.f32 %v79_v8, %v87_v17 }
 0x105   :  { %v92_v19 = vmul.f32 1.442695, %v89_v18 }
 0x107   :  { %361 = vpow2.f32 %v92_v19 }
 0x10a   :  { %v84_v20 = vpop.xlane.xlu0 %83 }
 0x10b   :  { %v88_v21 = vsub.f32 %v76_v11, %v84_v20 }
 0x10d   :  { %v362_v22 = vpop.eup %361  ;;  %v90_v23 = vmul.f32 1.442695, %v88_v21 }
 0x10e   :  { %v97_v24 = vsel %vm81_vm1, %v362_v22, 0.0 }
 0x10f   :  { %363 = vpow2.f32 %v90_v23  ;;  %98 = vadd.xlane.f32.xlu1 %v97_v24 }
 0x115   :  { %v364_v25 = vpop.eup %363 }
 0x116   :  { %v94_v26 = vsel %vm81_vm1, %v364_v25, 0.0 }
 0x117   :  { %95 = vadd.xlane.f32.xlu1 %v94_v26 }
 0x182   :  { %v99_v42 = vpop.xlane.xlu1 %98 }
 0x183   :  { %365 = vrcp.f32 %v99_v42 }
 0x189   :  { %v366_v43 = vpop.eup %365 }
 0x18a   :  { %v103_v44 = vmul.f32 %v366_v43, %v362_v22  ;;  %v96_v45 = vpop.xlane.xlu1 %95 }
 0x18b   :  { %367 = vrcp.f32 %v96_v45 }
 0x18c   :  { %105 = vst.msk [vmem:[#allocation2 + $0x8] sm:$0xff] %vm81_vm1, %v103_v44 }
 0x191   :  { %v368_v46 = vpop.eup %367 }
 0x192   :  { %v102_v47 = vmul.f32 %v368_v46, %v364_v25 }
 0x193   :  { %v107_v48 = vld [vmem:[#allocation2 + $0x8] sm:$0xff] }
 0x194   :  { %104 = vst.msk [vmem:[#allocation2] sm:$0xff] %vm81_vm1, %v102_v47  ;;  %334 = vmatmul.msk.f32.vlgmr.msra.gmra.mxu3 %vm81_vm1, %v107_v48  ;;  %220 = vperm.xlu1 %356, %v107_v48  }
 0x19b   :  { %v106_v49 = vld [vmem:[#allocation2] sm:$0xff] }
 0x19c   :  { %335 = vmatmul.msk.f32.vlgmr.msrb.gmra.mxu3 %vm51_vm0, %v485_v5  ;;  %216 = vperm.xlu0 %355, %v106_v49  }
 0x19d   :  { %145 = vperm.xlu2 %354, %v106_v49   ;;  %333 = vmatmul.msk.f32.vlgmr.msra.gmra.mxu2 %vm81_vm1, %v106_v49 }
 0x1a4   :  { %336 = vmatmul.msk.f32.gmra.mxu3 %vm51_vm0, %v480_v4  ;;  %359 = vset.pattern.permute.xlu0 %v426_v50 }
 0x1a5   :  { %150 = vperm.xlu2 %354, %v107_v48   ;;  %337 = vmatmul.msk.f32.vlgmr.msrb.gmra.mxu2 %vm51_vm0, %v485_v5  ;;  %v140_v5 = vpop.f32.mrf.mxu1 }
 0x1ad   :  { %357 = vset.pattern.permute.xlu2 %v427_v51  ;;  %338 = vmatmul.msk.f32.gmra.mxu2 %vm51_vm0, %v480_v4 }
 0x1ae   :  { %256 = vperm.xlu2 %357, %v106_v49  }
 0x1b6   :  { %260 = vperm.xlu2 %357, %v107_v48  }
 0x1be   :  { %358 = vset.pattern.permute.xlu2 %v426_v50 }
 0x1bf   :  { %296 = vperm.xlu2 %358, %v106_v49  }
 0x1c7   :  { %300 = vperm.xlu2 %358, %v107_v48  }
 0x1f7   :  { %v146_v52 = vpop.permute.xlu2 %145 }
 0x1f8   :  { %v153_v60 = vmul.f32 %v146_v52, %v137_v57 }
 0x1ff   :  { %v151_v53 = vpop.permute.xlu2 %150 }
 0x200   :  { %v154_v10 = vmul.f32 %v151_v53, %v140_v5 }
 0x206   :  { %v221_v9 = vpop.permute.xlu1 %220 }
 0x208   :  { %v257_v54 = vpop.permute.xlu2 %256 }
 0x20e   :  { %v217_v61 = vpop.permute.xlu0 %216 }
 0x210   :  { %v261_v56 = vpop.permute.xlu2 %260 }
 0x217   :  { %v184_v55 = vpop.f32.mrf.mxu3 }
 0x218   :  { %v185_v13 = vadd.f32 %v184_v55, %v154_v10 }
 0x219   :  { %v297_v1 = vpop.permute.xlu2 %296 }
 0x21a   :  { %v303_v7 = vmul.f32 %v297_v1, %v289_v62 }
 0x21f   :  { %v209_v59 = vpop.f32.mrf.mxu3 }
 0x220   :  { %v181_v58 = vpop.f32.mrf.mxu2  ;;  %v223_v0 = vmul.f32 %v217_v61, %v209_v59 }
 0x221   :  { %v182_v63 = vadd.f32 %v181_v58, %v153_v60  ;;  %v301_v15 = vpop.permute.xlu2 %300 }
 0x222   :  { %v304_v19 = vmul.f32 %v301_v15, %v292_v14 }
 0x223   :  { %v225_v3 = vadd.f32 %v223_v0, %v182_v63 }
 0x227   :  { %v212_v6 = vpop.f32.mrf.mxu3 }
 0x228   :  { %v249_v2 = vpop.f32.mrf.mxu2  ;;  %v224_v11 = vmul.f32 %v221_v9, %v212_v6 }
 0x229   :  { %v263_v4 = vmul.f32 %v257_v54, %v249_v2 }
 0x22a   :  { %v226_v17 = vadd.f32 %v224_v11, %v185_v13 }
 0x22b   :  { %v265_v8 = vadd.f32 %v263_v4, %v225_v3 }
 0x22d   :  { %v305_v12 = vadd.f32 %v303_v7, %v265_v8 }
 0x22f   :  { %307 = vst [vmem:[#allocation6] sm:$0xff] %v305_v12 }
 0x230   :  { %v252_v16 = vpop.f32.mrf.mxu2 }
 0x231   :  { %v264_v18 = vmul.f32 %v261_v56, %v252_v16 }
 0x233   :  { %v266_v20 = vadd.f32 %v264_v18, %v226_v17 }
 0x235   :  { %v306_v21 = vadd.f32 %v304_v19, %v266_v20 }
 0x237   :  { %308 = vst [vmem:[#allocation6 + $0x8] sm:$0xff] %v306_v21 }
 0x238   :  { %321 = dma.vmem_to_hbm [thread:$0]  %s314_s12, 256, %s316_s15, [#allocation5], %s422_s23, %s422_s23, %s423_s24  }
 0x239   :  { %419 = dma.done.wait [#allocation5], 256  }
 0x23a   :  { %420 = vsyncadd [#allocation5], 4294967040 }
 0x23b   :  { %326 = vsyncpa [#allocation4], 1 }
 0x23c   :  { %327 = vsyncpa [#allocation5], 1 }

</bundles_post_ra>
